<compile_context>
chip_gen: v5e
topology: v5e:2x2
jax: 0.10.0
libtpu: 0.0.40
codegen_flags: <defaults>
</compile_context>

<pallas_src>
import functools

import jax
import jax.numpy as jnp
from jax.experimental import pallas as pl
from jax.experimental.pallas import tpu as pltpu


def _gnn_kernel(a_ref, h_ref, w_ref, b_ref, out_ref, *, step):
    """One block of `block_b` graphs; runs `step` GNN-cell updates fully in VMEM.

    a_ref:   (block_b, N, 2N)   adjacency (in-edges | out-edges)
    h_ref:   (block_b*N, H)     hidden states, batch folded into rows
    w_ref:   (11, H, H)         packed weights (see pack_params for order)
    b_ref:   (8, H)             packed biases  (see pack_params for order)
    out_ref: (block_b*N, H)
    """
    block_b, n_nodes, _ = a_ref.shape

    def mm(x, w):
        return jnp.dot(x, w, preferred_element_type=jnp.float32)

    # --- unpack parameters once (reused across steps) -----------------------
    w_ein, w_eout = w_ref[0], w_ref[1]
    whh_r, whh_i, whh_n = w_ref[2], w_ref[3], w_ref[4]
    wih_in_r, wih_in_i, wih_in_n = w_ref[5], w_ref[6], w_ref[7]
    wih_out_r, wih_out_i, wih_out_n = w_ref[8], w_ref[9], w_ref[10]

    b = b_ref[...]
    b_ein, b_eout = b[0:1], b[1:2]
    b_iah, b_oah = b[2:3], b[3:4]
    b_r, b_i = b[4:5], b[5:6]            # b_ih_r + b_hh_r, b_ih_i + b_hh_i
    b_ihn, b_hhn = b[6:7], b[7:8]

    # --- split adjacency halves once in VMEM (reused across steps) ----------
    a_in, a_out = [], []
    for g in range(block_b):
        a_g = a_ref[g]                   # (N, 2N)
        a_in.append(a_g[:, :n_nodes])
        a_out.append(a_g[:, n_nodes:])

    h = h_ref[...]                       # (block_b*N, H), float32

    for _ in range(step):
        # Dense edge projections on the whole batch block at once.
        edge_in = mm(h, w_ein) + b_ein                       # (block_b*N, H)
        edge_out = mm(h, w_eout) + b_eout

        # Per-graph adjacency contractions (inherently per sample).
        in_parts, out_parts = [], []
        for g in range(block_b):
            lo, hi = g * n_nodes, (g + 1) * n_nodes
            in_parts.append(mm(a_in[g], edge_in[lo:hi, :]))
            out_parts.append(mm(a_out[g], edge_out[lo:hi, :]))
        input_in = jnp.concatenate(in_parts, axis=0) + b_iah     # (block_b*N, H)
        input_out = jnp.concatenate(out_parts, axis=0) + b_oah

        # Per-gate projections: no lane-axis concat, no 3H-wide gate slicing.
        r_pre = mm(input_in, wih_in_r) + mm(input_out, wih_out_r) + mm(h, whh_r) + b_r
        i_pre = mm(input_in, wih_in_i) + mm(input_out, wih_out_i) + mm(h, whh_i) + b_i
        i_n = mm(input_in, wih_in_n) + mm(input_out, wih_out_n) + b_ihn
        h_n = mm(h, whh_n) + b_hhn

        resetgate = jax.nn.sigmoid(r_pre)
        inputgate = jax.nn.sigmoid(i_pre)
        newgate = jnp.tanh(i_n + resetgate * h_n)
        h = newgate + inputgate * (h - newgate)

    out_ref[...] = h.astype(out_ref.dtype)


def _pick_block_b(batch, max_block=8):
    """Largest divisor of `batch` not exceeding `max_block`."""
    for d in range(min(batch, max_block), 0, -1):
        if batch % d == 0:
            return d
    return 1


def gnn_forward(A, hidden, w_stack, b_stack, *, step=1, block_b=None):
    """Equivalent of GNN.forward. A: (B, N, 2N) float32, hidden: (B, N, H) float32."""
    B, N, H = hidden.shape
    assert A.shape == (B, N, 2 * N)
    if block_b is None:
        block_b = _pick_block_b(B)
    assert B % block_b == 0
    grid = (B // block_b,)
    rows = block_b * N

    h2d = hidden.reshape(B * N, H)       # free reshape; lane layout unchanged

    out = pl.pallas_call(
        functools.partial(_gnn_kernel, step=step),
        out_shape=jax.ShapeDtypeStruct((B * N, H), hidden.dtype),
        grid=grid,
        in_specs=[
            pl.BlockSpec((block_b, N, 2 * N), lambda g: (g, 0, 0)),  # A (both halves)
            pl.BlockSpec((rows, H), lambda g: (g, 0)),               # hidden block
            pl.BlockSpec((11, H, H), lambda g: (0, 0, 0)),           # packed weights (resident)
            pl.BlockSpec((8, H), lambda g: (0, 0)),                  # packed biases (resident)
        ],
        out_specs=pl.BlockSpec((rows, H), lambda g: (g, 0)),
        compiler_params=pltpu.CompilerParams(
            dimension_semantics=("parallel",)),
    )(A, h2d, w_stack, b_stack)
    return out.reshape(B, N, H)


gnn_forward_jit = jax.jit(gnn_forward, static_argnames=("step", "block_b"))


def init_raw_params(key, hidden_size):
    """Deterministic synthetic parameters in the PyTorch module's native layouts."""
    H = hidden_size
    stdv = 1.0 / (H ** 0.5)
    ks = jax.random.split(key, 10)
    u = lambda k, shape: jax.random.uniform(
        k, shape, dtype=jnp.float32, minval=-stdv, maxval=stdv)
    return {
        "w_ih": u(ks[0], (3 * H, 2 * H)),   # (gate_size, input_size)
        "w_hh": u(ks[1], (3 * H, H)),
        "b_ih": u(ks[2], (3 * H,)),
        "b_hh": u(ks[3], (3 * H,)),
        "b_iah": u(ks[4], (H,)),
        "b_oah": u(ks[5], (H,)),
        "w_ein": u(ks[6], (H, H)),          # nn.Linear weight layout (out, in)
        "b_ein": u(ks[7], (H,)),
        "w_eout": u(ks[8], (H, H)),
        "b_eout": u(ks[9], (H,)),
    }


def pack_params(raw):
    """Pre-split / pre-transposed weights and packed biases for the kernel.

    Weight stack (each (H, H), used as right-multipliers x @ W):
      0 edge_in, 1 edge_out,
      2 whh_r, 3 whh_i, 4 whh_n,
      5 wih_in_r, 6 wih_in_i, 7 wih_in_n     (w_ih columns acting on input_in),
      8 wih_out_r, 9 wih_out_i, 10 wih_out_n (w_ih columns acting on input_out).
    Bias stack (each (H,)):
      0 b_ein, 1 b_eout, 2 b_iah, 3 b_oah,
      4 b_ih_r+b_hh_r, 5 b_ih_i+b_hh_i, 6 b_ih_n, 7 b_hh_n.
    """
    H = raw["b_iah"].shape[0]
    w_ih_t = raw["w_ih"].T      # (2H, 3H): gi = [input_in | input_out] @ w_ih_t
    w_hh_t = raw["w_hh"].T      # (H, 3H):  gh = hidden @ w_hh_t
    w_stack = jnp.stack([
        raw["w_ein"].T, raw["w_eout"].T,
        w_hh_t[:, 0:H], w_hh_t[:, H:2 * H], w_hh_t[:, 2 * H:3 * H],
        w_ih_t[:H, 0:H], w_ih_t[:H, H:2 * H], w_ih_t[:H, 2 * H:3 * H],
        w_ih_t[H:, 0:H], w_ih_t[H:, H:2 * H], w_ih_t[H:, 2 * H:3 * H],
    ])                          # (11, H, H)
    b_stack = jnp.stack([
        raw["b_ein"], raw["b_eout"], raw["b_iah"], raw["b_oah"],
        raw["b_ih"][0:H] + raw["b_hh"][0:H],
        raw["b_ih"][H:2 * H] + raw["b_hh"][H:2 * H],
        raw["b_ih"][2 * H:3 * H],
        raw["b_hh"][2 * H:3 * H],
    ])                          # (8, H)
    return w_stack, b_stack


def reference_forward(A, hidden, raw, step=1):
    """Pure-JAX mirror of the PyTorch GNN.forward, for the correctness check."""
    N = A.shape[1]
    for _ in range(step):
        edge_in = hidden @ raw["w_ein"].T + raw["b_ein"]
        edge_out = hidden @ raw["w_eout"].T + raw["b_eout"]
        input_in = jnp.matmul(A[:, :, :N], edge_in) + raw["b_iah"]
        input_out = jnp.matmul(A[:, :, N:2 * N], edge_out) + raw["b_oah"]
        inputs = jnp.concatenate([input_in, input_out], axis=2)
        gi = inputs @ raw["w_ih"].T + raw["b_ih"]
        gh = hidden @ raw["w_hh"].T + raw["b_hh"]
        i_r, i_i, i_n = jnp.split(gi, 3, axis=2)
        h_r, h_i, h_n = jnp.split(gh, 3, axis=2)
        resetgate = jax.nn.sigmoid(i_r + h_r)
        inputgate = jax.nn.sigmoid(i_i + h_i)
        newgate = jnp.tanh(i_n + resetgate * h_n)
        hidden = newgate + inputgate * (hidden - newgate)
    return hidden


if __name__ == "__main__":
    key = jax.random.PRNGKey(0)
    # (B, N, H, step, block_b): default small case + a multi-grid-step / multi-step case.
    cases = [(2, 16, 32, 1, None), (4, 16, 32, 2, 2)]
    for (B, N, H, step, block_b) in cases:
        key, k_a, k_h, k_p = jax.random.split(key, 4)
        # Adjacency (in|out) as SR-GNN builds it: dense, normalized, non-negative.
        A = jax.random.uniform(k_a, (B, N, 2 * N), dtype=jnp.float32)
        hidden = jax.random.normal(k_h, (B, N, H), dtype=jnp.float32)
        raw = init_raw_params(k_p, H)
        w_stack, b_stack = pack_params(raw)

        out = gnn_forward_jit(A, hidden, w_stack, b_stack, step=step, block_b=block_b)
        out = jax.block_until_ready(out)

        ref = reference_forward(A, hidden, raw, step=step)
        assert out.shape == (B, N, H)
        max_err = float(jnp.max(jnp.abs(out - ref)))
        assert jnp.allclose(out, ref, atol=1e-4, rtol=1e-4), f"max abs err {max_err}"

    print("KERNEL_OK")
</pallas_src>

<mosaic_0001>
module attributes {stable_mosaic.version = 11 : i64} {
  func.func @_gnn_kernel(%arg0: i32, %arg1: memref<2x16x32xf32, #tpu.memory_space<vmem>>, %arg2: memref<32x32xf32, #tpu.memory_space<vmem>>, %arg3: memref<11x32x32xf32, #tpu.memory_space<vmem>>, %arg4: memref<8x32xf32, #tpu.memory_space<vmem>>, %arg5: memref<32x32xf32, #tpu.memory_space<vmem>>) attributes {dimension_semantics = [#tpu.dimension_semantics<parallel>], iteration_bounds = array<i64: 1>, scalar_prefetch = 0 : i64, scratch_operands = 0 : i64, tpu.core_type = #tpu.core_type<tc>, window_params = [{transform_indices = @transform_0, window_bounds = array<i64: 2, 16, 32>}, {transform_indices = @transform_1, window_bounds = array<i64: 32, 32>}, {pipeline_mode = #tpu.pipeline_mode<synchronous>, transform_indices = @transform_2, window_bounds = array<i64: 11, 32, 32>}, {pipeline_mode = #tpu.pipeline_mode<synchronous>, transform_indices = @transform_3, window_bounds = array<i64: 8, 32>}, {transform_indices = @transform_4, window_bounds = array<i64: 32, 32>}]} {
    %c0 = arith.constant 0 : index
    %c0_0 = arith.constant 0 : index
    %c0_1 = arith.constant 0 : index
    %0 = vector.load %arg3[%c0, %c0_0, %c0_1] : memref<11x32x32xf32, #tpu.memory_space<vmem>>, vector<1x32x32xf32>
    %1 = vector.shape_cast %0 : vector<1x32x32xf32> to vector<32x32xf32>
    %c1 = arith.constant 1 : index
    %c0_2 = arith.constant 0 : index
    %c0_3 = arith.constant 0 : index
    %2 = vector.load %arg3[%c1, %c0_2, %c0_3] : memref<11x32x32xf32, #tpu.memory_space<vmem>>, vector<1x32x32xf32>
    %3 = vector.shape_cast %2 : vector<1x32x32xf32> to vector<32x32xf32>
    %c2 = arith.constant 2 : index
    %c0_4 = arith.constant 0 : index
    %c0_5 = arith.constant 0 : index
    %4 = vector.load %arg3[%c2, %c0_4, %c0_5] : memref<11x32x32xf32, #tpu.memory_space<vmem>>, vector<1x32x32xf32>
    %5 = vector.shape_cast %4 : vector<1x32x32xf32> to vector<32x32xf32>
    %c3 = arith.constant 3 : index
    %c0_6 = arith.constant 0 : index
    %c0_7 = arith.constant 0 : index
    %6 = vector.load %arg3[%c3, %c0_6, %c0_7] : memref<11x32x32xf32, #tpu.memory_space<vmem>>, vector<1x32x32xf32>
    %7 = vector.shape_cast %6 : vector<1x32x32xf32> to vector<32x32xf32>
    %c4 = arith.constant 4 : index
    %c0_8 = arith.constant 0 : index
    %c0_9 = arith.constant 0 : index
    %8 = vector.load %arg3[%c4, %c0_8, %c0_9] : memref<11x32x32xf32, #tpu.memory_space<vmem>>, vector<1x32x32xf32>
    %9 = vector.shape_cast %8 : vector<1x32x32xf32> to vector<32x32xf32>
    %c5 = arith.constant 5 : index
    %c0_10 = arith.constant 0 : index
    %c0_11 = arith.constant 0 : index
    %10 = vector.load %arg3[%c5, %c0_10, %c0_11] : memref<11x32x32xf32, #tpu.memory_space<vmem>>, vector<1x32x32xf32>
    %11 = vector.shape_cast %10 : vector<1x32x32xf32> to vector<32x32xf32>
    %c6 = arith.constant 6 : index
    %c0_12 = arith.constant 0 : index
    %c0_13 = arith.constant 0 : index
    %12 = vector.load %arg3[%c6, %c0_12, %c0_13] : memref<11x32x32xf32, #tpu.memory_space<vmem>>, vector<1x32x32xf32>
    %13 = vector.shape_cast %12 : vector<1x32x32xf32> to vector<32x32xf32>
    %c7 = arith.constant 7 : index
    %c0_14 = arith.constant 0 : index
    %c0_15 = arith.constant 0 : index
    %14 = vector.load %arg3[%c7, %c0_14, %c0_15] : memref<11x32x32xf32, #tpu.memory_space<vmem>>, vector<1x32x32xf32>
    %15 = vector.shape_cast %14 : vector<1x32x32xf32> to vector<32x32xf32>
    %c8 = arith.constant 8 : index
    %c0_16 = arith.constant 0 : index
    %c0_17 = arith.constant 0 : index
    %16 = vector.load %arg3[%c8, %c0_16, %c0_17] : memref<11x32x32xf32, #tpu.memory_space<vmem>>, vector<1x32x32xf32>
    %17 = vector.shape_cast %16 : vector<1x32x32xf32> to vector<32x32xf32>
    %c9 = arith.constant 9 : index
    %c0_18 = arith.constant 0 : index
    %c0_19 = arith.constant 0 : index
    %18 = vector.load %arg3[%c9, %c0_18, %c0_19] : memref<11x32x32xf32, #tpu.memory_space<vmem>>, vector<1x32x32xf32>
    %19 = vector.shape_cast %18 : vector<1x32x32xf32> to vector<32x32xf32>
    %c10 = arith.constant 10 : index
    %c0_20 = arith.constant 0 : index
    %c0_21 = arith.constant 0 : index
    %20 = vector.load %arg3[%c10, %c0_20, %c0_21] : memref<11x32x32xf32, #tpu.memory_space<vmem>>, vector<1x32x32xf32>
    %21 = vector.shape_cast %20 : vector<1x32x32xf32> to vector<32x32xf32>
    %c0_22 = arith.constant 0 : index
    %c0_23 = arith.constant 0 : index
    %22 = vector.load %arg4[%c0_22, %c0_23] : memref<8x32xf32, #tpu.memory_space<vmem>>, vector<8x32xf32>
    %23 = vector.extract_strided_slice %22 {offsets = [0, 0], sizes = [1, 32], strides = [1, 1]} : vector<8x32xf32> to vector<1x32xf32>
    %24 = vector.extract_strided_slice %22 {offsets = [1, 0], sizes = [1, 32], strides = [1, 1]} : vector<8x32xf32> to vector<1x32xf32>
    %25 = vector.extract_strided_slice %22 {offsets = [2, 0], sizes = [1, 32], strides = [1, 1]} : vector<8x32xf32> to vector<1x32xf32>
    %26 = vector.extract_strided_slice %22 {offsets = [3, 0], sizes = [1, 32], strides = [1, 1]} : vector<8x32xf32> to vector<1x32xf32>
    %27 = vector.extract_strided_slice %22 {offsets = [4, 0], sizes = [1, 32], strides = [1, 1]} : vector<8x32xf32> to vector<1x32xf32>
    %28 = vector.extract_strided_slice %22 {offsets = [5, 0], sizes = [1, 32], strides = [1, 1]} : vector<8x32xf32> to vector<1x32xf32>
    %29 = vector.extract_strided_slice %22 {offsets = [6, 0], sizes = [1, 32], strides = [1, 1]} : vector<8x32xf32> to vector<1x32xf32>
    %30 = vector.extract_strided_slice %22 {offsets = [7, 0], sizes = [1, 32], strides = [1, 1]} : vector<8x32xf32> to vector<1x32xf32>
    %c0_24 = arith.constant 0 : index
    %c0_25 = arith.constant 0 : index
    %c0_26 = arith.constant 0 : index
    %31 = vector.load %arg1[%c0_24, %c0_25, %c0_26] : memref<2x16x32xf32, #tpu.memory_space<vmem>>, vector<1x16x32xf32>
    %32 = vector.shape_cast %31 : vector<1x16x32xf32> to vector<16x32xf32>
    %33 = vector.extract_strided_slice %32 {offsets = [0, 0], sizes = [16, 16], strides = [1, 1]} : vector<16x32xf32> to vector<16x16xf32>
    %34 = vector.extract_strided_slice %32 {offsets = [0, 16], sizes = [16, 16], strides = [1, 1]} : vector<16x32xf32> to vector<16x16xf32>
    %c1_27 = arith.constant 1 : index
    %c0_28 = arith.constant 0 : index
    %c0_29 = arith.constant 0 : index
    %35 = vector.load %arg1[%c1_27, %c0_28, %c0_29] : memref<2x16x32xf32, #tpu.memory_space<vmem>>, vector<1x16x32xf32>
    %36 = vector.shape_cast %35 : vector<1x16x32xf32> to vector<16x32xf32>
    %37 = vector.extract_strided_slice %36 {offsets = [0, 0], sizes = [16, 16], strides = [1, 1]} : vector<16x32xf32> to vector<16x16xf32>
    %38 = vector.extract_strided_slice %36 {offsets = [0, 16], sizes = [16, 16], strides = [1, 1]} : vector<16x32xf32> to vector<16x16xf32>
    %c0_30 = arith.constant 0 : index
    %c0_31 = arith.constant 0 : index
    %39 = vector.load %arg2[%c0_30, %c0_31] : memref<32x32xf32, #tpu.memory_space<vmem>>, vector<32x32xf32>
    %cst = arith.constant dense<0.000000e+00> : vector<32x32xf32>
    %40 = tpu.matmul %39, %1, %cst {dimension_numbers = #tpu.dot_dimension_numbers<[1], [0], [0], [1], [0, 0, 1, 1], [], []>} : vector<32x32xf32>, vector<32x32xf32>, vector<32x32xf32> -> vector<32x32xf32>
    %41 = vector.broadcast %23 : vector<1x32xf32> to vector<32x32xf32>
    %42 = arith.addf %40, %41 : vector<32x32xf32>
    %cst_32 = arith.constant dense<0.000000e+00> : vector<32x32xf32>
    %43 = tpu.matmul %39, %3, %cst_32 {dimension_numbers = #tpu.dot_dimension_numbers<[1], [0], [0], [1], [0, 0, 1, 1], [], []>} : vector<32x32xf32>, vector<32x32xf32>, vector<32x32xf32> -> vector<32x32xf32>
    %44 = vector.broadcast %24 : vector<1x32xf32> to vector<32x32xf32>
    %45 = arith.addf %43, %44 : vector<32x32xf32>
    %46 = vector.extract_strided_slice %42 {offsets = [0, 0], sizes = [16, 32], strides = [1, 1]} : vector<32x32xf32> to vector<16x32xf32>
    %cst_33 = arith.constant dense<0.000000e+00> : vector<16x32xf32>
    %47 = tpu.matmul %33, %46, %cst_33 {dimension_numbers = #tpu.dot_dimension_numbers<[1], [0], [0], [1], [0, 0, 1, 1], [], []>} : vector<16x16xf32>, vector<16x32xf32>, vector<16x32xf32> -> vector<16x32xf32>
    %48 = vector.extract_strided_slice %45 {offsets = [0, 0], sizes = [16, 32], strides = [1, 1]} : vector<32x32xf32> to vector<16x32xf32>
    %cst_34 = arith.constant dense<0.000000e+00> : vector<16x32xf32>
    %49 = tpu.matmul %34, %48, %cst_34 {dimension_numbers = #tpu.dot_dimension_numbers<[1], [0], [0], [1], [0, 0, 1, 1], [], []>} : vector<16x16xf32>, vector<16x32xf32>, vector<16x32xf32> -> vector<16x32xf32>
    %50 = vector.extract_strided_slice %42 {offsets = [16, 0], sizes = [16, 32], strides = [1, 1]} : vector<32x32xf32> to vector<16x32xf32>
    %cst_35 = arith.constant dense<0.000000e+00> : vector<16x32xf32>
    %51 = tpu.matmul %37, %50, %cst_35 {dimension_numbers = #tpu.dot_dimension_numbers<[1], [0], [0], [1], [0, 0, 1, 1], [], []>} : vector<16x16xf32>, vector<16x32xf32>, vector<16x32xf32> -> vector<16x32xf32>
    %52 = vector.extract_strided_slice %45 {offsets = [16, 0], sizes = [16, 32], strides = [1, 1]} : vector<32x32xf32> to vector<16x32xf32>
    %cst_36 = arith.constant dense<0.000000e+00> : vector<16x32xf32>
    %53 = tpu.matmul %38, %52, %cst_36 {dimension_numbers = #tpu.dot_dimension_numbers<[1], [0], [0], [1], [0, 0, 1, 1], [], []>} : vector<16x16xf32>, vector<16x32xf32>, vector<16x32xf32> -> vector<16x32xf32>
    %54 = tpu.concatenate %47, %51 in 0 : vector<16x32xf32>, vector<16x32xf32> -> vector<32x32xf32>
    %55 = vector.broadcast %25 : vector<1x32xf32> to vector<32x32xf32>
    %56 = arith.addf %54, %55 : vector<32x32xf32>
    %57 = tpu.concatenate %49, %53 in 0 : vector<16x32xf32>, vector<16x32xf32> -> vector<32x32xf32>
    %58 = vector.broadcast %26 : vector<1x32xf32> to vector<32x32xf32>
    %59 = arith.addf %57, %58 : vector<32x32xf32>
    %cst_37 = arith.constant dense<0.000000e+00> : vector<32x32xf32>
    %60 = tpu.matmul %56, %11, %cst_37 {dimension_numbers = #tpu.dot_dimension_numbers<[1], [0], [0], [1], [0, 0, 1, 1], [], []>} : vector<32x32xf32>, vector<32x32xf32>, vector<32x32xf32> -> vector<32x32xf32>
    %cst_38 = arith.constant dense<0.000000e+00> : vector<32x32xf32>
    %61 = tpu.matmul %59, %17, %cst_38 {dimension_numbers = #tpu.dot_dimension_numbers<[1], [0], [0], [1], [0, 0, 1, 1], [], []>} : vector<32x32xf32>, vector<32x32xf32>, vector<32x32xf32> -> vector<32x32xf32>
    %62 = arith.addf %60, %61 : vector<32x32xf32>
    %cst_39 = arith.constant dense<0.000000e+00> : vector<32x32xf32>
    %63 = tpu.matmul %39, %5, %cst_39 {dimension_numbers = #tpu.dot_dimension_numbers<[1], [0], [0], [1], [0, 0, 1, 1], [], []>} : vector<32x32xf32>, vector<32x32xf32>, vector<32x32xf32> -> vector<32x32xf32>
    %64 = arith.addf %62, %63 : vector<32x32xf32>
    %65 = vector.broadcast %27 : vector<1x32xf32> to vector<32x32xf32>
    %66 = arith.addf %64, %65 : vector<32x32xf32>
    %cst_40 = arith.constant dense<0.000000e+00> : vector<32x32xf32>
    %67 = tpu.matmul %56, %13, %cst_40 {dimension_numbers = #tpu.dot_dimension_numbers<[1], [0], [0], [1], [0, 0, 1, 1], [], []>} : vector<32x32xf32>, vector<32x32xf32>, vector<32x32xf32> -> vector<32x32xf32>
    %cst_41 = arith.constant dense<0.000000e+00> : vector<32x32xf32>
    %68 = tpu.matmul %59, %19, %cst_41 {dimension_numbers = #tpu.dot_dimension_numbers<[1], [0], [0], [1], [0, 0, 1, 1], [], []>} : vector<32x32xf32>, vector<32x32xf32>, vector<32x32xf32> -> vector<32x32xf32>
    %69 = arith.addf %67, %68 : vector<32x32xf32>
    %cst_42 = arith.constant dense<0.000000e+00> : vector<32x32xf32>
    %70 = tpu.matmul %39, %7, %cst_42 {dimension_numbers = #tpu.dot_dimension_numbers<[1], [0], [0], [1], [0, 0, 1, 1], [], []>} : vector<32x32xf32>, vector<32x32xf32>, vector<32x32xf32> -> vector<32x32xf32>
    %71 = arith.addf %69, %70 : vector<32x32xf32>
    %72 = vector.broadcast %28 : vector<1x32xf32> to vector<32x32xf32>
    %73 = arith.addf %71, %72 : vector<32x32xf32>
    %cst_43 = arith.constant dense<0.000000e+00> : vector<32x32xf32>
    %74 = tpu.matmul %56, %15, %cst_43 {dimension_numbers = #tpu.dot_dimension_numbers<[1], [0], [0], [1], [0, 0, 1, 1], [], []>} : vector<32x32xf32>, vector<32x32xf32>, vector<32x32xf32> -> vector<32x32xf32>
    %cst_44 = arith.constant dense<0.000000e+00> : vector<32x32xf32>
    %75 = tpu.matmul %59, %21, %cst_44 {dimension_numbers = #tpu.dot_dimension_numbers<[1], [0], [0], [1], [0, 0, 1, 1], [], []>} : vector<32x32xf32>, vector<32x32xf32>, vector<32x32xf32> -> vector<32x32xf32>
    %76 = arith.addf %74, %75 : vector<32x32xf32>
    %77 = vector.broadcast %29 : vector<1x32xf32> to vector<32x32xf32>
    %78 = arith.addf %76, %77 : vector<32x32xf32>
    %cst_45 = arith.constant dense<0.000000e+00> : vector<32x32xf32>
    %79 = tpu.matmul %39, %9, %cst_45 {dimension_numbers = #tpu.dot_dimension_numbers<[1], [0], [0], [1], [0, 0, 1, 1], [], []>} : vector<32x32xf32>, vector<32x32xf32>, vector<32x32xf32> -> vector<32x32xf32>
    %80 = vector.broadcast %30 : vector<1x32xf32> to vector<32x32xf32>
    %81 = arith.addf %79, %80 : vector<32x32xf32>
    %82 = arith.negf %66 : vector<32x32xf32>
    %83 = math.exp %82 : vector<32x32xf32>
    %cst_46 = arith.constant 1.000000e+00 : f32
    %84 = vector.broadcast %cst_46 : f32 to vector<32x32xf32>
    %85 = arith.addf %84, %83 : vector<32x32xf32>
    %86 = arith.divf %84, %85 : vector<32x32xf32>
    %87 = arith.negf %73 : vector<32x32xf32>
    %88 = math.exp %87 : vector<32x32xf32>
    %cst_47 = arith.constant 1.000000e+00 : f32
    %89 = vector.broadcast %cst_47 : f32 to vector<32x32xf32>
    %90 = arith.addf %89, %88 : vector<32x32xf32>
    %91 = arith.divf %89, %90 : vector<32x32xf32>
    %92 = arith.mulf %86, %81 : vector<32x32xf32>
    %93 = arith.addf %78, %92 : vector<32x32xf32>
    %94 = math.tanh %93 : vector<32x32xf32>
    %95 = arith.subf %39, %94 : vector<32x32xf32>
    %96 = arith.mulf %91, %95 : vector<32x32xf32>
    %97 = arith.addf %94, %96 : vector<32x32xf32>
    %c0_48 = arith.constant 0 : index
    %c0_49 = arith.constant 0 : index
    %98 = vector.load %arg5[%c0_48, %c0_49] : memref<32x32xf32, #tpu.memory_space<vmem>>, vector<32x32xf32>
    tpu.vector_store %arg5[%c0_48, %c0_49], %97 {strides = array<i32>} : memref<32x32xf32, #tpu.memory_space<vmem>>, vector<32x32xf32>,
    return
  }
  func.func @transform_0(%arg0: i32) -> (i32, i32, i32) {
    %c0_i32 = arith.constant 0 : i32
    %c0_i32_0 = arith.constant 0 : i32
    %c0_i32_1 = arith.constant 0 : i32
    return %arg0, %c0_i32, %c0_i32_0 : i32, i32, i32
  }
  func.func @transform_1(%arg0: i32) -> (i32, i32) {
    %c0_i32 = arith.constant 0 : i32
    %c0_i32_0 = arith.constant 0 : i32
    return %arg0, %c0_i32 : i32, i32
  }
  func.func @transform_2(%arg0: i32) -> (i32, i32, i32) {
    %c0_i32 = arith.constant 0 : i32
    %c0_i32_0 = arith.constant 0 : i32
    %c0_i32_1 = arith.constant 0 : i32
    %c0_i32_2 = arith.constant 0 : i32
    return %c0_i32, %c0_i32_0, %c0_i32_1 : i32, i32, i32
  }
  func.func @transform_3(%arg0: i32) -> (i32, i32) {
    %c0_i32 = arith.constant 0 : i32
    %c0_i32_0 = arith.constant 0 : i32
    %c0_i32_1 = arith.constant 0 : i32
    return %c0_i32, %c0_i32_0 : i32, i32
  }
  func.func @transform_4(%arg0: i32) -> (i32, i32) {
    %c0_i32 = arith.constant 0 : i32
    %c0_i32_0 = arith.constant 0 : i32
    return %arg0, %c0_i32 : i32, i32
  }
}

</mosaic_0001>

<bundles_post_ra>
// kernel: gnn_forward.1
= control target key start
LH: loop header
LB: loop body
LE: loop exit
PB: predicated region body
PF: predicated region fallthrough
CT: control target
= control target key end

     0   :  { %9 = vsyncpa [#allocation3], 0  ;;  %s1442_s0 = inlined_call_operand.hbm [shape: f32[2,16,32], index: 0, kind: input, shape index: {}]   ;;  %s1443_s1 = inlined_call_operand.hbm [shape: f32[32,32], index: 1, kind: input, shape index: {}]   ;;  %s1444_s2 = inlined_call_operand.hbm [shape: f32[11,32,32], index: 2, kind: input, shape index: {}]   ;;  %s1445_s3 = inlined_call_operand.hbm [shape: f32[8,32], index: 3, kind: input, shape index: {}]   ;;  %s1446_s4 = inlined_call_operand.hbm [shape: f32[32,32], index: 4, kind: output, shape index: {}]  }
   0x1   :  { %10 = vsyncpa [#allocation6], 0 }
   0x2   :  { %11 = vsyncpa [#allocation9], 0 }
   0x3   :  { %12 = vsyncpa [#allocation4], 0  ;;  %s30_s17 = sshll.u32 %s1443_s1, 4  ;;  %s1097_s18 = smov [#allocation5]   ;;  %s31_s17 = int_to_ptr.hbm [resolvable:$true] %s30_s17 }
   0x4   :  { %s32_s19 = sshll.u32 %s1097_s18, 4  ;;  %s17_s22 = sshll.u32 %s1442_s0, 4  ;;  %s33_s19 = int_to_ptr.vmem [resolvable:$true] %s32_s19  ;;  %s18_s22 = int_to_ptr.hbm [resolvable:$true] %s17_s22 }
   0x5   :  { %s1098_s23 = smov 128   ;;  %s1099_s24 = smov 8  }
   0x6   :  { %38 = dma.hbm_to_vmem [thread:$0]  %s31_s17, 512, %s33_s19, [#allocation6], %s1098_s23, %s1098_s23, %s1099_s24  }
   0x7   :  { %s1100_s25 = smov [#allocation2]   ;;  %s43_s1 = sshll.u32 %s1444_s2, 4  ;;  %s44_s1 = int_to_ptr.hbm [resolvable:$true] %s43_s1 }
   0x8   :  { %s19_s26 = sshll.u32 %s1100_s25, 4  ;;  %s57_s30 = sshll.u32 %s1445_s3, 4  ;;  %s20_s26 = int_to_ptr.vmem [resolvable:$true] %s19_s26  ;;  %s58_s30 = int_to_ptr.hbm [resolvable:$true] %s57_s30 }
   0x9   :  { %25 = dma.hbm_to_vmem [thread:$0]  %s18_s22, 512, %s20_s26, [#allocation3], %s1098_s23, %s1098_s23, %s1099_s24  }
   0xa   :  { %s1101_s5 = smov [#allocation7]   ;;  %s1102_s7 = smov [#allocation8]  }
   0xb   :  { %s45_s6 = sshll.u32 %s1101_s5, 4  ;;  %s59_s2 = sshll.u32 %s1102_s7, 4  ;;  %s46_s6 = int_to_ptr.vmem [resolvable:$true] %s45_s6  ;;  %s60_s2 = int_to_ptr.vmem [resolvable:$true] %s59_s2 }
   0xc   :  { %51 = dma.hbm_to_vmem [thread:$0]  %s44_s1, 5632, %s46_s6, [#allocation6], %s1098_s23, %s1098_s23, %s1099_s24  }
   0xd   :  { %62 = dma.hbm_to_vmem [thread:$0]  %s58_s30, 128, %s60_s2, [#allocation9]  }
   0xe   :  { %1089 = dma.done.wait [#allocation3], 512  }
   0xf   :  { %1090 = vsyncadd [#allocation3], 4294966784 }
  0x10   :  { %1091 = dma.done.wait [#allocation6], 6144  }
  0x11   :  { %1092 = vsyncadd [#allocation6], 4294961152 }
  0x12   :  { %1093 = dma.done.wait [#allocation9], 128  }
  0x13   :  { %1094 = vsyncadd [#allocation9], 4294967168  ;;  %v82_v0 = vld [vmem:[#allocation7 + $0x18] sm:$0xff]  ;;  %v81_v2 = vld [vmem:[#allocation7 + $0x10] sm:$0xff]  ;;  %vm144_vm0 = vcmask 261120   ;;  %s1103_s3 = smov 112  }
  0x14   :  { %v87_v1 = vld [vmem:[#allocation7 + $0x38] sm:$0xff]  ;;  %169 = vmatpush.msra.mxu0 %v82_v0  ;;  %v86_v3 = vld [vmem:[#allocation7 + $0x30] sm:$0xff]  ;;  %v80_v4 = vld [vmem:[#allocation7 + $0x8] sm:$0xff]  ;;  %vm216_vm1 = vcmask 130048   ;;  %s1104_s8 = smov [#allocation10]   ;;  %s842_s12 = sshll.u32 %s1446_s4, 4  ;;  %s843_s12 = int_to_ptr.hbm [resolvable:$true] %s842_s12 }
  0x15   :  { %199 = vmatpush.msra.mxu1 %v87_v1  ;;  %v85_v5 = vld [vmem:[#allocation7 + $0x28] sm:$0xff]  ;;  %v79_v6 = vld [vmem:[#allocation7] sm:$0xff]  ;;  %v1151_v9 = vld [vmem:[#allocation2 + $0x10] sm:$0xff]  ;;  %s840_s9 = sshll.u32 %s1104_s8, 4  ;;  %s841_s9 = int_to_ptr.vmem [resolvable:$true] %s840_s9 }
  0x16   :  { %170 = vmatpush.msra.mxu0 %v81_v2  ;;  %v84_v7 = vld [vmem:[#allocation7 + $0x20] sm:$0xff]  ;;  %306 = vrot.lane.b32.xlu1 %v1151_v9, %s1103_s3  ;;  %v135_v11 = vld [vmem:[#allocation2 + $0x8] sm:$0xff]  ;;  %v138_v12 = vld [vmem:[#allocation2 + $0x18] sm:$0xff] }
  0x17   :  { %200 = vmatpush.msra.mxu1 %v86_v3  ;;  %v134_v8 = vld [vmem:[#allocation2] sm:$0xff]  ;;  %v1160_v13 = vld [vmem:[#allocation5 + $0x8] sm:$0xff]  ;;  %v1166_v14 = vld [vmem:[#allocation5 + $0x10] sm:$0xff] }
  0x18   :  { %171 = vmatpush.msra.mxu0 %v80_v4  ;;  %v1153_v10 = vld [vmem:[#allocation5] sm:$0xff]  ;;  %246 = vrot.lane.b32.xlu0 %v134_v8, %s1103_s3  ;;  %v1172_v15 = vld [vmem:[#allocation5 + $0x18] sm:$0xff]  ;;  %v91_v39 = vld [vmem:[#allocation7 + $0x50] sm:$0xff] }
  0x19   :  { %201 = vmatpush.msra.mxu1 %v85_v5  ;;  %v1178_v18 = vld [vmem:[#allocation8] sm:$0xff]  ;;  %v92_v37 = vld [vmem:[#allocation7 + $0x58] sm:$0xff]  ;;  %v106_v40 = vld [vmem:[#allocation7 + $0xb0] sm:$0xff] }
  0x1a   :  { %172 = vmatpush.msra.mxu0 %v79_v6  ;;  %v143_v19 = vperm.slane %v1178_v18, 0  ;;  %v186_v22 = vperm.slane %v1178_v18, 1  ;;  %v107_v38 = vld [vmem:[#allocation7 + $0xb8] sm:$0xff]  ;;  %v90_v41 = vld [vmem:[#allocation7 + $0x48] sm:$0xff]  ;;  %v89_v43 = vld [vmem:[#allocation7 + $0x40] sm:$0xff]  ;;  %v337_v60 = vperm.slane %v1178_v18, 2 }
  0x1b   :  { %202 = vmatpush.msra.mxu1 %v84_v7  ;;  %857 = vmatmul.msk.f32.vlgmr.msra.gmra.mxu0 %vm144_vm0, %v1153_v10  ;;  %v105_v45 = vld [vmem:[#allocation7 + $0xa8] sm:$0xff]  ;;  %v104_v46 = vld [vmem:[#allocation7 + $0xa0] sm:$0xff]  ;;  %v122_v47 = vld [vmem:[#allocation7 + $0x118] sm:$0xff]  ;;  %v342_v7 = vperm.slane %v1178_v18, 3 }
  0x1c   :  { %861 = vmatmul.msk.f32.vlgmr.msra.gmra.mxu1 %vm144_vm0, %v1153_v10  ;;  %v127_v48 = vld [vmem:[#allocation7 + $0x138] sm:$0xff]  ;;  %v121_v49 = vld [vmem:[#allocation7 + $0x110] sm:$0xff]  ;;  %v120_v53 = vld [vmem:[#allocation7 + $0x108] sm:$0xff] }
  0x1d   :  { %v126_v50 = vld [vmem:[#allocation7 + $0x130] sm:$0xff]  ;;  %v132_v51 = vld [vmem:[#allocation7 + $0x158] sm:$0xff]  ;;  %v125_v54 = vld [vmem:[#allocation7 + $0x128] sm:$0xff] }
  0x1e   :  { %308 = vrot.lane.b32.xlu1 %v138_v12, %s1103_s3  ;;  %v131_v52 = vld [vmem:[#allocation7 + $0x150] sm:$0xff]  ;;  %v130_v55 = vld [vmem:[#allocation7 + $0x148] sm:$0xff]  ;;  %v119_v56 = vld [vmem:[#allocation7 + $0x100] sm:$0xff] }
  0x1f   :  { %v124_v57 = vld [vmem:[#allocation7 + $0x120] sm:$0xff]  ;;  %v112_v59 = vld [vmem:[#allocation7 + $0xd8] sm:$0xff]  ;;  %v111_v62 = vld [vmem:[#allocation7 + $0xd0] sm:$0xff] }
  0x20   :  { %248 = vrot.lane.b32.xlu0 %v135_v11, %s1103_s3  ;;  %v129_v58 = vld [vmem:[#allocation7 + $0x140] sm:$0xff]  ;;  %v97_v0 = vld [vmem:[#allocation7 + $0x78] sm:$0xff]  ;;  %v110_v2 = vld [vmem:[#allocation7 + $0xc8] sm:$0xff] }
  0x21   :  { %v117_v4 = vld [vmem:[#allocation7 + $0xf8] sm:$0xff]  ;;  %v116_v5 = vld [vmem:[#allocation7 + $0xf0] sm:$0xff] }
  0x22   :  { %v96_v6 = vld [vmem:[#allocation7 + $0x70] sm:$0xff] }
  0x23   :  { %858 = vmatmul.msk.f32.gmra.mxu0 %vm144_vm0, %v1160_v13 }
  0x24   :  { %862 = vmatmul.msk.f32.gmra.mxu1 %vm144_vm0, %v1160_v13 }
  0x2b   :  { %859 = vmatmul.msk.f32.gmra.mxu0 %vm144_vm0, %v1166_v14 }
  0x2c   :  { %863 = vmatmul.msk.f32.gmra.mxu1 %vm144_vm0, %v1166_v14 }
  0x33   :  { %860 = vmatmul.msk.f32.gmra.mxu0 %vm144_vm0, %v1172_v15 }
  0x34   :  { %864 = vmatmul.msk.f32.gmra.mxu1 %vm144_vm0, %v1172_v15 }
  0x88   :  { %v307_v42 = vpop.permute.xlu1 %306 }
  0x8a   :  { %v247_v29 = vpop.permute.xlu0 %246 }
  0x90   :  { %v309_v44 = vpop.permute.xlu1 %308 }
  0x92   :  { %v249_v36 = vpop.permute.xlu0 %248 }
  0x98   :  { %v174_v16 = vpop.f32.mrf.mxu0 }
  0x99   :  { %v204_v17 = vpop.f32.mrf.mxu1  ;;  %v175_v24 = vadd.f32 %v174_v16, %v143_v19 }
  0x9a   :  { %v205_v26 = vadd.f32 %v204_v17, %v186_v22  ;;  %v114_v17 = vld [vmem:[#allocation7 + $0xe0] sm:$0xff] }
  0xa0   :  { %v177_v20 = vpop.f32.mrf.mxu0 }
  0xa1   :  { %v207_v21 = vpop.f32.mrf.mxu1  ;;  %v178_v23 = vadd.f32 %v177_v20, %v143_v19 }
  0xa2   :  { %v208_v25 = vadd.f32 %v207_v21, %v186_v22  ;;  %v94_v21 = vld [vmem:[#allocation7 + $0x60] sm:$0xff] }
  0xa3   :  { %237 = vmatpush.msrb.mxu1 %v178_v23  ;;  %917 = vmatpush.msra.mxu3 %v178_v23 }
  0xa5   :  { %238 = vmatpush.msrb.mxu1 %v175_v24  ;;  %918 = vmatpush.msra.mxu3 %v175_v24 }
  0xa6   :  { %866 = vmatmul.msk.f32.vlgmr.msra.gmra.mxu3 %vm216_vm1, %v135_v11  ;;  %865 = vmatmul.msk.f32.vlgmr.msrb.gmra.mxu1 %vm216_vm1, %v134_v8  ;;  %v109_v8 = vld [vmem:[#allocation7 + $0xc0] sm:$0xff]  ;;  %v115_v11 = vld [vmem:[#allocation7 + $0xe8] sm:$0xff] }
  0xa7   :  { %268 = vmatpush.msrb.mxu3 %v208_v25  ;;  %479 = vmatpush.msra.mxu1 %v127_v48 }
  0xa8   :  { %v180_v27 = vpop.f32.mrf.mxu0 }
  0xa9   :  { %v210_v28 = vpop.f32.mrf.mxu1  ;;  %269 = vmatpush.msrb.mxu3 %v205_v26  ;;  %v181_v32 = vadd.f32 %v180_v27, %v143_v19  ;;  %480 = vmatpush.msra.mxu1 %v126_v50  ;;  %v101_v27 = vld [vmem:[#allocation7 + $0x90] sm:$0xff] }
  0xaa   :  { %v211_v35 = vadd.f32 %v210_v28, %v186_v22 }
  0xab   :  { %481 = vmatpush.msra.mxu1 %v125_v54 }
  0xad   :  { %482 = vmatpush.msra.mxu1 %v124_v57 }
  0xae   :  { %867 = vmatmul.msk.f32.vlgmr.msrb.gmra.mxu3 %vm216_vm1, %v247_v29 }
  0xaf   :  { %604 = vmatpush.msrb.mxu1 %v117_v4 }
  0xb0   :  { %v183_v30 = vpop.f32.mrf.mxu0 }
  0xb1   :  { %v213_v31 = vpop.f32.mrf.mxu1  ;;  %v184_v33 = vadd.f32 %v183_v30, %v143_v19  ;;  %605 = vmatpush.msrb.mxu1 %v116_v5  ;;  %v100_v30 = vld [vmem:[#allocation7 + $0x88] sm:$0xff] }
  0xb2   :  { %v214_v34 = vadd.f32 %v213_v31, %v186_v22  ;;  %v102_v22 = vld [vmem:[#allocation7 + $0x98] sm:$0xff] }
  0xb3   :  { %297 = vmatpush.msrb.mxu0 %v184_v33  ;;  %919 = vmatpush.msra.mxu2 %v184_v33  ;;  %v99_v33 = vld [vmem:[#allocation7 + $0x80] sm:$0xff] }
  0xb4   :  { %328 = vmatpush.msra.mxu3 %v214_v34  ;;  %606 = vmatpush.msrb.mxu1 %v115_v11 }
  0xb5   :  { %298 = vmatpush.msrb.mxu0 %v181_v32  ;;  %920 = vmatpush.msra.mxu2 %v181_v32 }
  0xb6   :  { %329 = vmatpush.msra.mxu3 %v211_v35  ;;  %869 = vmatmul.msk.f32.vlgmr.msrb.gmra.mxu0 %vm216_vm1, %v1151_v9  ;;  %v95_v9 = vld [vmem:[#allocation7 + $0x68] sm:$0xff] }
  0xb7   :  { %868 = vmatmul.msk.f32.gmra.mxu3 %vm216_vm1, %v249_v36  ;;  %870 = vmatmul.msk.f32.vlgmr.msra.gmra.mxu2 %vm216_vm1, %v138_v12 }
  0xb8   :  { %441 = vmatpush.msra.mxu0 %v92_v37  ;;  %412 = vmatpush.msrb.mxu3 %v107_v38 }
  0xb9   :  { %371 = vmatpush.msrb.mxu2 %v122_v47  ;;  %607 = vmatpush.msrb.mxu1 %v114_v17 }
  0xba   :  { %442 = vmatpush.msra.mxu0 %v91_v39  ;;  %413 = vmatpush.msrb.mxu3 %v106_v40 }
  0xbb   :  { %372 = vmatpush.msrb.mxu2 %v121_v49 }
  0xbc   :  { %443 = vmatpush.msra.mxu0 %v90_v41  ;;  %414 = vmatpush.msrb.mxu3 %v105_v45 }
  0xbd   :  { %373 = vmatpush.msrb.mxu2 %v120_v53 }
  0xbe   :  { %444 = vmatpush.msra.mxu0 %v89_v43  ;;  %415 = vmatpush.msrb.mxu3 %v104_v46 }
  0xbf   :  { %871 = vmatmul.msk.f32.vlgmr.msra.gmra.mxu3 %vm216_vm1, %v307_v42  ;;  %881 = vmatmul.msk.f32.vlgmr.msra.gmra.mxu0 %vm144_vm0, %v1153_v10  ;;  %v462_v42 = vperm.slane %v1178_v18, 4 }
  0xc0   :  { %575 = vmatpush.msrb.mxu0 %v132_v51  ;;  %374 = vmatpush.msrb.mxu2 %v119_v56 }
  0xc1   :  { %537 = vmatpush.msra.mxu3 %v97_v0  ;;  %v1248_v0 = vperm.slane %v1178_v18, 5 }
  0xc2   :  { %576 = vmatpush.msrb.mxu0 %v131_v52  ;;  %508 = vmatpush.msra.mxu2 %v112_v59 }
  0xc3   :  { %538 = vmatpush.msra.mxu3 %v96_v6 }
  0xc4   :  { %577 = vmatpush.msrb.mxu0 %v130_v55  ;;  %509 = vmatpush.msra.mxu2 %v111_v62 }
  0xc5   :  { %539 = vmatpush.msra.mxu3 %v95_v9 }
  0xc6   :  { %578 = vmatpush.msrb.mxu0 %v129_v58  ;;  %510 = vmatpush.msra.mxu2 %v110_v2 }
  0xc7   :  { %872 = vmatmul.msk.f32.gmra.mxu3 %vm216_vm1, %v309_v44  ;;  %882 = vmatmul.msk.f32.gmra.mxu0 %vm144_vm0, %v1160_v13 }
  0xc8   :  { %511 = vmatpush.msra.mxu2 %v109_v8  ;;  %540 = vmatpush.msra.mxu3 %v94_v21 }
  0xcf   :  { %883 = vmatmul.msk.f32.gmra.mxu0 %vm144_vm0, %v1166_v14 }
  0xd7   :  { %884 = vmatmul.msk.f32.gmra.mxu0 %vm144_vm0, %v1172_v15 }
 0x123   :  { %v240_v61 = vpop.f32.mrf.mxu1 }
 0x124   :  { %v1200_v63 = vadd.f32 %v337_v60, %v240_v61 }
 0x126   :  { %877 = vmatmul.msk.f32.vlgmr.msrb.gmra.mxu3 %vm144_vm0, %v1200_v63 }
 0x129   :  { %v243_v1 = vpop.f32.mrf.mxu3 }
 0x12a   :  { %v339_v3 = vadd.f32 %v337_v60, %v243_v1 }
 0x12e   :  { %878 = vmatmul.msk.f32.gmra.mxu3 %vm144_vm0, %v339_v3 }
 0x131   :  { %v271_v12 = vpop.f32.mrf.mxu3 }
 0x132   :  { %v343_v16 = vadd.f32 %v342_v7, %v271_v12 }
 0x133   :  { %v300_v19 = vpop.f32.mrf.mxu0 }
 0x134   :  { %873 = vmatmul.msk.f32.vlgmr.msrb.gmra.mxu2 %vm144_vm0, %v343_v16  ;;  %885 = vmatmul.msk.f32.vlgmr.msra.gmra.mxu1 %vm144_vm0, %v343_v16  ;;  %v340_v20 = vadd.f32 %v337_v60, %v300_v19 }
 0x135   :  { %897 = vmatmul.msk.f32.vlgmr.msrb.gmra.mxu0 %vm144_vm0, %v343_v16  ;;  %639 = vmatpush.msrb.mxu2 %v102_v22 }
 0x136   :  { %879 = vmatmul.msk.f32.gmra.mxu3 %vm144_vm0, %v340_v20 }
 0x137   :  { %640 = vmatpush.msrb.mxu2 %v101_v27 }
 0x139   :  { %641 = vmatpush.msrb.mxu2 %v100_v30 }
 0x13a   :  { %v274_v23 = vpop.f32.mrf.mxu3  ;;  %v303_v24 = vpop.f32.mrf.mxu2 }
 0x13b   :  { %v344_v25 = vadd.f32 %v342_v7, %v274_v23  ;;  %v341_v26 = vadd.f32 %v337_v60, %v303_v24  ;;  %642 = vmatpush.msrb.mxu2 %v99_v33 }
 0x13c   :  { %v446_v37 = vpop.f32.mrf.mxu0 }
 0x13d   :  { %874 = vmatmul.msk.f32.gmra.mxu2 %vm144_vm0, %v344_v25  ;;  %886 = vmatmul.msk.f32.gmra.mxu1 %vm144_vm0, %v344_v25 }
 0x13e   :  { %898 = vmatmul.msk.f32.gmra.mxu0 %vm144_vm0, %v344_v25  ;;  %880 = vmatmul.msk.f32.gmra.mxu3 %vm144_vm0, %v341_v26 }
 0x142   :  { %v331_v28 = vpop.f32.mrf.mxu3 }
 0x143   :  { %v345_v29 = vadd.f32 %v342_v7, %v331_v28 }
 0x144   :  { %v449_v44 = vpop.f32.mrf.mxu0 }
 0x145   :  { %875 = vmatmul.msk.f32.gmra.mxu2 %vm144_vm0, %v345_v29  ;;  %887 = vmatmul.msk.f32.gmra.mxu1 %vm144_vm0, %v345_v29 }
 0x146   :  { %899 = vmatmul.msk.f32.gmra.mxu0 %vm144_vm0, %v345_v29  ;;  %893 = vmatmul.msk.f32.vlgmr.msra.gmra.mxu3 %vm144_vm0, %v1153_v10 }
 0x14a   :  { %v334_v31 = vpop.f32.mrf.mxu3 }
 0x14b   :  { %v346_v32 = vadd.f32 %v342_v7, %v334_v31 }
 0x14c   :  { %v452_v54 = vpop.f32.mrf.mxu0 }
 0x14d   :  { %876 = vmatmul.msk.f32.gmra.mxu2 %vm144_vm0, %v346_v32  ;;  %888 = vmatmul.msk.f32.gmra.mxu1 %vm144_vm0, %v346_v32 }
 0x14e   :  { %900 = vmatmul.msk.f32.gmra.mxu0 %vm144_vm0, %v346_v32  ;;  %894 = vmatmul.msk.f32.gmra.mxu3 %vm144_vm0, %v1160_v13 }
 0x155   :  { %889 = vmatmul.msk.f32.vlgmr.msra.gmra.mxu2 %vm144_vm0, %v1200_v63  ;;  %901 = vmatmul.msk.f32.vlgmr.msrb.gmra.mxu1 %vm144_vm0, %v1200_v63 }
 0x156   :  { %895 = vmatmul.msk.f32.gmra.mxu3 %vm144_vm0, %v1166_v14 }
 0x15d   :  { %890 = vmatmul.msk.f32.gmra.mxu2 %vm144_vm0, %v339_v3  ;;  %902 = vmatmul.msk.f32.gmra.mxu1 %vm144_vm0, %v339_v3  ;;  %v455_v3 = vpop.f32.mrf.mxu0 }
 0x15e   :  { %896 = vmatmul.msk.f32.gmra.mxu3 %vm144_vm0, %v1172_v15 }
 0x165   :  { %891 = vmatmul.msk.f32.gmra.mxu2 %vm144_vm0, %v340_v20  ;;  %903 = vmatmul.msk.f32.gmra.mxu1 %vm144_vm0, %v340_v20 }
 0x16d   :  { %892 = vmatmul.msk.f32.gmra.mxu2 %vm144_vm0, %v341_v26  ;;  %904 = vmatmul.msk.f32.gmra.mxu1 %vm144_vm0, %v341_v26 }
 0x175   :  { %905 = vmatmul.msk.f32.vlgmr.msrb.gmra.mxu2 %vm144_vm0, %v1153_v10 }
 0x17d   :  { %906 = vmatmul.msk.f32.gmra.mxu2 %vm144_vm0, %v1160_v13 }
 0x185   :  { %907 = vmatmul.msk.f32.gmra.mxu2 %vm144_vm0, %v1166_v14 }
 0x18d   :  { %908 = vmatmul.msk.f32.gmra.mxu2 %vm144_vm0, %v1172_v15 }
 0x1a9   :  { %v417_v34 = vpop.f32.mrf.mxu3 }
 0x1b1   :  { %v420_v36 = vpop.f32.mrf.mxu3  ;;  %v484_v43 = vpop.f32.mrf.mxu1 }
 0x1b7   :  { %v376_v35 = vpop.f32.mrf.mxu2 }
 0x1b8   :  { %v418_v40 = vadd.f32 %v417_v34, %v376_v35 }
 0x1b9   :  { %v423_v39 = vpop.f32.mrf.mxu3 }
 0x1ba   :  { %v458_v41 = vadd.f32 %v446_v37, %v418_v40  ;;  %v487_v51 = vpop.f32.mrf.mxu1 }
 0x1bc   :  { %v463_v46 = vadd.f32 %v462_v42, %v458_v41  ;;  %v580_v41 = vpop.f32.mrf.mxu0 }
 0x1be   :  { %v909_v49 = vmul.f32 -1.442695, %v463_v46 }
 0x1c0   :  { %v379_v38 = vpop.f32.mrf.mxu2  ;;  %929 = vpow2.f32 %v909_v49 }
 0x1c1   :  { %v421_v47 = vadd.f32 %v420_v36, %v379_v38  ;;  %v426_v48 = vpop.f32.mrf.mxu3 }
 0x1c2   :  { %v490_v2 = vpop.f32.mrf.mxu1 }
 0x1c3   :  { %v459_v50 = vadd.f32 %v449_v44, %v421_v47 }
 0x1c5   :  { %v464_v55 = vadd.f32 %v462_v42, %v459_v50 }
 0x1c6   :  { %v930_v59 = vpop.eup %929 }
 0x1c7   :  { %v910_v58 = vmul.f32 -1.442695, %v464_v55  ;;  %v1250_v1 = vadd.f32 1.0, %v930_v59 }
 0x1c8   :  { %v382_v45 = vpop.f32.mrf.mxu2 }
 0x1c9   :  { %v424_v52 = vadd.f32 %v423_v39, %v382_v45  ;;  %v542_v56 = vpop.f32.mrf.mxu3  ;;  %931 = vpow2.f32 %v910_v58  ;;  %v1290_v58 = vperm.slane %v1178_v18, 7  ;;  %vm677_vm3 = vweird.f32 %v1250_v1 }
 0x1ca   :  { %933 = vrcp.f32 %v1250_v1  ;;  %v493_v22 = vpop.f32.mrf.mxu1  ;;  %v681_v59 = vand.u32 2147483647, %v1250_v1 }
 0x1cb   :  { %v460_v57 = vadd.f32 %v452_v54, %v424_v52 }
 0x1cc   :  { %vm682_vm5 = vcmp.eq.f32.partialorder %v681_v59, 8.507059e+37 }
 0x1cd   :  { %v465_v60 = vadd.f32 %v462_v42, %v460_v57 }
 0x1cf   :  { %v911_v5 = vmul.f32 -1.442695, %v465_v60  ;;  %v932_v9 = vpop.eup %931 }
 0x1d0   :  { %v385_v53 = vpop.f32.mrf.mxu2  ;;  %v1254_v19 = vadd.f32 1.0, %v932_v9  ;;  %v1256_v21 = vpop.eup %933 }
 0x1d1   :  { %v427_v61 = vadd.f32 %v426_v48, %v385_v53  ;;  %v545_v7 = vpop.f32.mrf.mxu3  ;;  %935 = vpow2.f32 %v911_v5  ;;  %v673_v29 = vmul.f32 %v1256_v21, %v1250_v1  ;;  %vm678_vm2 = vweird.f32 %v1256_v21 }
 0x1d2   :  { %v609_v39 = vpop.f32.mrf.mxu1  ;;  %vm1300_vm4 = vmor %vm677_vm3, %vm678_vm2  ;;  %vm692_vm7 = vweird.f32 %v1254_v19 }
 0x1d3   :  { %v461_v6 = vadd.f32 %v455_v3, %v427_v61  ;;  %v674_v35 = vsub.f32 1.0, %v673_v29  ;;  %v610_v60 = vadd.f32 %v609_v39, %v580_v41  ;;  %v1296_v61 = vperm.slane %v1178_v18, 6 }
 0x1d5   :  { %v466_v12 = vadd.f32 %v462_v42, %v461_v6 }
 0x1d7   :  { %v912_v23 = vmul.f32 -1.442695, %v466_v12  ;;  %v936_v25 = vpop.eup %935  ;;  %v583_v12 = vpop.f32.mrf.mxu0 }
 0x1d8   :  { %v513_v62 = vpop.f32.mrf.mxu2  ;;  %v1264_v33 = vadd.f32 1.0, %v936_v25 }
 0x1d9   :  { %v514_v63 = vadd.f32 %v513_v62, %v484_v43  ;;  %v548_v26 = vpop.f32.mrf.mxu3  ;;  %v675_v43 = vmul.f32 %v1256_v21, %v674_v35 }
 0x1da   :  { %v612_v18 = vpop.f32.mrf.mxu1  ;;  %vm707_vm14 = vweird.f32 %v1264_v33 }
 0x1db   :  { %v554_v4 = vadd.f32 %v542_v56, %v514_v63  ;;  %v676_v52 = vadd.f32 %v1256_v21, %v675_v43  ;;  %v683_v56 = vand.u32 2147483648, %v1250_v1 }
 0x1dd   :  { %v559_v8 = vadd.f32 %v1248_v0, %v554_v4 }
 0x1df   :  { %v913_v11 = vmul.f32 -1.442695, %v559_v8 }
 0x1e0   :  { %v516_v16 = vpop.f32.mrf.mxu2 }
 0x1e1   :  { %937 = vpow2.f32 %v913_v11  ;;  %v517_v17 = vadd.f32 %v516_v16, %v487_v51  ;;  %v551_v47 = vpop.f32.mrf.mxu3  ;;  %v696_v11 = vand.u32 2147483647, %v1254_v19  ;;  %v622_v16 = vadd.f32 %v1296_v61, %v610_v60 }
 0x1e2   :  { %939 = vrcp.f32 %v1254_v19 }
 0x1e3   :  { %v555_v20 = vadd.f32 %v545_v7, %v517_v17  ;;  %941 = vpow2.f32 %v912_v23  ;;  %v684_v7 = vor.u32 1.1754944e-38, %v683_v56  ;;  %vm1331_vm9 = vcmp.eq.f32.partialorder %v696_v11, 8.507059e+37 }
 0x1e5   :  { %v560_v24 = vadd.f32 %v1248_v0, %v555_v20  ;;  %v698_v20 = vand.u32 2147483648, %v1254_v19 }
 0x1e7   :  { %v938_v27 = vpop.eup %937  ;;  %v914_v28 = vmul.f32 -1.442695, %v560_v24 }
 0x1e8   :  { %v1262_v30 = vadd.f32 1.0, %v938_v27  ;;  %v519_v31 = vpop.f32.mrf.mxu2  ;;  %v1267_v36 = vpop.eup %939  ;;  %v613_v27 = vadd.f32 %v612_v18, %v583_v12 }
 0x1e9   :  { %943 = vpow2.f32 %v914_v28  ;;  %v520_v32 = vadd.f32 %v519_v31, %v490_v2  ;;  %v942_v38 = vpop.eup %941  ;;  %v688_v44 = vmul.f32 %v1267_v36, %v1254_v19  ;;  %v680_v2 = vsel %vm1300_vm4, %v1256_v21, %v676_v52 }
 0x1ea   :  { %945 = vrcp.f32 %v1262_v30  ;;  %v1278_v50 = vadd.f32 1.0, %v942_v38  ;;  %v685_v17 = vsel %vm682_vm5, %v684_v7, %v680_v2  ;;  %vm693_vm6 = vweird.f32 %v1267_v36 }
 0x1eb   :  { %v556_v34 = vadd.f32 %v548_v26, %v520_v32  ;;  %947 = vrcp.f32 %v1264_v33  ;;  %v689_v53 = vsub.f32 1.0, %v688_v44  ;;  %vm1327_vm8 = vmor %vm692_vm7, %vm693_vm6  ;;  %v699_v32 = vor.u32 1.1754944e-38, %v698_v20 }
 0x1ec   :  { %v759_v43 = vand.u32 2147483648, %v1262_v30  ;;  %v623_v44 = vadd.f32 %v1296_v61, %v613_v27  ;;  %vm753_vm11 = vweird.f32 %v1262_v30  ;;  %v711_v2 = vand.u32 2147483647, %v1264_v33 }
 0x1ed   :  { %v561_v37 = vadd.f32 %v1248_v0, %v556_v34  ;;  %v690_v1 = vmul.f32 %v1267_v36, %v689_v53  ;;  %v728_v20 = vand.u32 2147483648, %v1278_v50  ;;  %vm722_vm7 = vweird.f32 %v1278_v50 }
 0x1ee   :  { %vm712_vm3 = vcmp.eq.f32.partialorder %v711_v2, 8.507059e+37 }
 0x1ef   :  { %v944_v40 = vpop.eup %943  ;;  %v915_v42 = vmul.f32 -1.442695, %v561_v37 }
 0x1f0   :  { %v1274_v45 = vadd.f32 1.0, %v944_v40  ;;  %v522_v46 = vpop.f32.mrf.mxu2  ;;  %v1276_v48 = vpop.eup %945 }
 0x1f1   :  { %949 = vpow2.f32 %v915_v42  ;;  %v523_v49 = vadd.f32 %v522_v46, %v493_v22  ;;  %v1283_v54 = vpop.eup %947  ;;  %v749_v55 = vmul.f32 %v1276_v48, %v1262_v30  ;;  %v691_v22 = vadd.f32 %v1267_v36, %v690_v1 }
 0x1f2   :  { %951 = vrcp.f32 %v1274_v45  ;;  %v703_v3 = vmul.f32 %v1283_v54, %v1264_v33  ;;  %vm754_vm10 = vweird.f32 %v1276_v48  ;;  %v713_v46 = vand.u32 2147483648, %v1264_v33 }
 0x1f3   :  { %v557_v51 = vadd.f32 %v551_v47, %v523_v49  ;;  %953 = vrcp.f32 %v1278_v50  ;;  %v750_v4 = vsub.f32 1.0, %v749_v55  ;;  %v695_v35 = vsel %vm1327_vm8, %v1267_v36, %v691_v22  ;;  %v615_v47 = vpop.f32.mrf.mxu1  ;;  %vm1358_vm13 = vmor %vm753_vm11, %vm754_vm10 }
 0x1f4   :  { %v704_v23 = vsub.f32 1.0, %v703_v3  ;;  %v757_v49 = vand.u32 2147483647, %v1262_v30  ;;  %vm708_vm12 = vweird.f32 %v1283_v54  ;;  %v714_v18 = vor.u32 1.1754944e-38, %v713_v46 }
 0x1f5   :  { %v562_v57 = vadd.f32 %v1248_v0, %v557_v51  ;;  %v751_v25 = vmul.f32 %v1276_v48, %v750_v4  ;;  %v700_v51 = vsel %vm1331_vm9, %v699_v32, %v695_v35  ;;  %vm1375_vm1 = vmor %vm707_vm14, %vm708_vm12  ;;  %vm768_vm4 = vweird.f32 %v1274_v45 }
 0x1f6   :  { %v705_v37 = vmul.f32 %v1283_v54, %v704_v23  ;;  %vm758_vm15 = vcmp.eq.f32.partialorder %v757_v49, 8.507059e+37 }
 0x1f7   :  { %v950_v63 = vpop.eup %949  ;;  %v916_v0 = vmul.f32 -1.442695, %v562_v57  ;;  %v752_v40 = vadd.f32 %v1276_v48, %v751_v25  ;;  %v586_v57 = vpop.f32.mrf.mxu0 }
 0x1f8   :  { %v1310_v5 = vadd.f32 1.0, %v950_v63  ;;  %v644_v6 = vpop.f32.mrf.mxu2  ;;  %v1312_v8 = vpop.eup %951  ;;  %v706_v55 = vadd.f32 %v1283_v54, %v705_v37  ;;  %v760_v63 = vor.u32 1.1754944e-38, %v759_v43  ;;  %v616_v1 = vadd.f32 %v615_v47, %v586_v57 }
 0x1f9   :  { %955 = vpow2.f32 %v916_v0  ;;  %v645_v9 = vadd.f32 %v644_v6, %v1290_v58  ;;  %v1321_v24 = vpop.eup %953  ;;  %v764_v26 = vmul.f32 %v1312_v8, %v1274_v45  ;;  %v756_v60 = vsel %vm1358_vm13, %v1276_v48, %v752_v40 }
 0x1fa   :  { %957 = vrcp.f32 %v1310_v5  ;;  %v718_v19 = vmul.f32 %v1321_v24, %v1278_v50  ;;  %v761_v6 = vsel %vm758_vm15, %v760_v63, %v756_v60  ;;  %v710_v48 = vsel %vm1375_vm1, %v1283_v54, %v706_v55 }
 0x1fb   :  { %v808_v21 = vmul.f32 %v685_v17, %v645_v9  ;;  %v765_v38 = vsub.f32 1.0, %v764_v26  ;;  %vm769_vm2 = vweird.f32 %v1312_v8  ;;  %v715_v22 = vsel %vm712_vm3, %v714_v18, %v710_v48  ;;  %v618_v29 = vpop.f32.mrf.mxu1 }
 0x1fc   :  { %v719_v56 = vsub.f32 1.0, %v718_v19  ;;  %vm1392_vm5 = vmor %vm768_vm4, %vm769_vm2  ;;  %v624_v25 = vadd.f32 %v1296_v61, %v616_v1  ;;  %vm723_vm6 = vweird.f32 %v1321_v24  ;;  %v726_v37 = vand.u32 2147483647, %v1278_v50 }
 0x1fd   :  { %v812_v28 = vadd.f32 %v808_v21, %v622_v16  ;;  %v766_v30 = vmul.f32 %v1312_v8, %v765_v38  ;;  %v774_v16 = vand.u32 2147483648, %v1274_v45  ;;  %v772_v21 = vand.u32 2147483647, %v1274_v45  ;;  %vm1409_vm9 = vmor %vm722_vm7, %vm723_vm6 }
 0x1fe   :  { %v720_v7 = vmul.f32 %v1321_v24, %v719_v56  ;;  %vm727_vm11 = vcmp.eq.f32.partialorder %v726_v37, 8.507059e+37  ;;  %vm783_vm12 = vweird.f32 %v1310_v5  ;;  %v787_v52 = vand.u32 2147483647, %v1310_v5 }
 0x1ff   :  { %v956_v34 = vpop.eup %955  ;;  %959 = vtanh.f32 %v812_v28  ;;  %v589_v19 = vpop.f32.mrf.mxu0  ;;  %vm773_vm8 = vcmp.eq.f32.partialorder %v772_v21, 8.507059e+37 }
 0x200   :  { %v1342_v39 = vadd.f32 1.0, %v956_v34  ;;  %v647_v41 = vpop.f32.mrf.mxu2  ;;  %v1345_v42 = vpop.eup %957  ;;  %v721_v27 = vadd.f32 %v1321_v24, %v720_v7  ;;  %v775_v34 = vor.u32 1.1754944e-38, %v774_v16  ;;  %v619_v43 = vadd.f32 %v618_v29, %v589_v19 }
 0x201   :  { %v648_v36 = vadd.f32 %v647_v41, %v1290_v58  ;;  %v779_v59 = vmul.f32 %v1345_v42, %v1310_v5  ;;  %v729_v41 = vor.u32 1.1754944e-38, %v728_v20  ;;  %vm784_vm10 = vweird.f32 %v1345_v42 }
 0x202   :  { %961 = vrcp.f32 %v1342_v39  ;;  %vm785_vm13 = vmor %vm783_vm12, %vm784_vm10  ;;  %vm788_vm14 = vcmp.eq.f32.partialorder %v787_v52, 8.507059e+37  ;;  %v804_v63 = vand.u32 2147483648, %v1342_v39  ;;  %vm798_vm1 = vweird.f32 %v1342_v39 }
 0x203   :  { %v809_v53 = vmul.f32 %v700_v51, %v648_v36  ;;  %v780_v33 = vsub.f32 1.0, %v779_v59 }
 0x204   :  { %v805_v1 = vor.u32 1.1754944e-38, %v804_v63 }
 0x205   :  { %v960_v62 = vpop.eup %959  ;;  %v813_v0 = vadd.f32 %v809_v53, %v623_v44  ;;  %v781_v28 = vmul.f32 %v1345_v42, %v780_v33 }
 0x206   :  { %v820_v3 = vsub.f32 %v1153_v10, %v960_v62  ;;  %v767_v10 = vadd.f32 %v1312_v8, %v766_v30 }
 0x207   :  { %963 = vtanh.f32 %v813_v0  ;;  %v782_v46 = vadd.f32 %v1345_v42, %v781_v28 }
 0x208   :  { %v824_v9 = vmul.f32 %v820_v3, %v761_v6  ;;  %v650_v11 = vpop.f32.mrf.mxu2  ;;  %v1385_v12 = vpop.eup %961  ;;  %v771_v45 = vsel %vm1392_vm5, %v1312_v8, %v767_v10  ;;  %v725_v8 = vsel %vm1409_vm9, %v1321_v24, %v721_v27  ;;  %v625_v24 = vadd.f32 %v1296_v61, %v619_v43 }
 0x209   :  { %v651_v17 = vadd.f32 %v650_v11, %v1290_v58  ;;  %v794_v31 = vmul.f32 %v1385_v12, %v1342_v39  ;;  %v776_v44 = vsel %vm773_vm8, %v775_v34, %v771_v45  ;;  %v730_v53 = vsel %vm727_vm11, %v729_v41, %v725_v8 }
 0x20a   :  { %v828_v54 = vadd.f32 %v960_v62, %v824_v9  ;;  %v786_v57 = vsel %vm785_vm13, %v1345_v42, %v782_v46  ;;  %vm799_vm15 = vweird.f32 %v1385_v12  ;;  %v802_v42 = vand.u32 2147483647, %v1342_v39 }
 0x20b   :  { %v810_v26 = vmul.f32 %v715_v22, %v651_v17  ;;  %v795_v36 = vsub.f32 1.0, %v794_v31  ;;  %vm800_vm2 = vmor %vm798_vm1, %vm799_vm15 }
 0x20c   :  { %832 = vst.msk [vmem:[#allocation10] sm:$0xff] %vm144_vm0, %v828_v54  ;;  %vm803_vm3 = vcmp.eq.f32.partialorder %v802_v42, 8.507059e+37 }
 0x20d   :  { %v964_v32 = vpop.eup %963  ;;  %v814_v35 = vadd.f32 %v810_v26, %v624_v25  ;;  %v796_v56 = vmul.f32 %v1385_v12, %v795_v36 }
 0x20e   :  { %v821_v38 = vsub.f32 %v1160_v13, %v964_v32  ;;  %v789_v13 = vand.u32 2147483648, %v1310_v5 }
 0x20f   :  { %965 = vtanh.f32 %v814_v35  ;;  %v797_v61 = vadd.f32 %v1385_v12, %v796_v56 }
 0x210   :  { %v825_v50 = vmul.f32 %v821_v38, %v776_v44  ;;  %v653_v47 = vpop.f32.mrf.mxu2  ;;  %v790_v59 = vor.u32 1.1754944e-38, %v789_v13 }
 0x211   :  { %v654_v49 = vadd.f32 %v653_v47, %v1290_v58  ;;  %v801_v2 = vsel %vm800_vm2, %v1385_v12, %v797_v61 }
 0x212   :  { %v829_v51 = vadd.f32 %v964_v32, %v825_v50  ;;  %v791_v62 = vsel %vm788_vm14, %v790_v59, %v786_v57  ;;  %v806_v4 = vsel %vm803_vm3, %v805_v1, %v801_v2 }
 0x213   :  { %v811_v55 = vmul.f32 %v730_v53, %v654_v49 }
 0x214   :  { %833 = vst.msk [vmem:[#allocation10 + $0x8] sm:$0xff] %vm144_vm0, %v829_v51 }
 0x215   :  { %v966_v30 = vpop.eup %965  ;;  %v815_v58 = vadd.f32 %v811_v55, %v625_v24 }
 0x216   :  { %v822_v60 = vsub.f32 %v1166_v14, %v966_v30 }
 0x217   :  { %967 = vtanh.f32 %v815_v58 }
 0x218   :  { %v826_v5 = vmul.f32 %v822_v60, %v791_v62 }
 0x21a   :  { %v830_v0 = vadd.f32 %v966_v30, %v826_v5 }
 0x21c   :  { %834 = vst.msk [vmem:[#allocation10 + $0x10] sm:$0xff] %vm144_vm0, %v830_v0 }
 0x21d   :  { %v968_v14 = vpop.eup %967 }
 0x21e   :  { %v823_v3 = vsub.f32 %v1172_v15, %v968_v14 }
 0x220   :  { %v827_v18 = vmul.f32 %v823_v3, %v806_v4 }
 0x222   :  { %v831_v6 = vadd.f32 %v968_v14, %v827_v18 }
 0x224   :  { %835 = vst.msk [vmem:[#allocation10 + $0x18] sm:$0xff] %vm144_vm0, %v831_v6 }
 0x225   :  { %848 = dma.vmem_to_hbm [thread:$0]  %s841_s9, 512, %s843_s12, [#allocation4], %s1098_s23, %s1098_s23, %s1099_s24  }
 0x226   :  { %1095 = dma.done.wait [#allocation4], 512  }
 0x227   :  { %1096 = vsyncadd [#allocation4], 4294966784 }
 0x228   :  { %853 = vsyncpa [#allocation3], 1 }
 0x229   :  { %854 = vsyncpa [#allocation6], 1 }
 0x22a   :  { %855 = vsyncpa [#allocation9], 1 }
 0x22b   :  { %856 = vsyncpa [#allocation4], 1 }

</bundles_post_ra>
